<compile_context>
chip_gen: v7x
topology: tpu7x:2x2x1
jax: 0.10.0
libtpu: 0.0.40
codegen_flags: <defaults>
</compile_context>

<pallas_src>
from functools import partial

import jax
import jax.numpy as jnp
from jax.experimental import pallas as pl
from jax.experimental.pallas import tpu as pltpu


def _round_up(n, m):
    return ((n + m - 1) // m) * m


def _mlp_kernel(x_ref, w1_ref, b1_ref, w2_ref, b2_ref, w3_ref, b3_ref, o_ref):
    """Fused 3-layer MLP: relu(relu(x@W1+b1)@W2+b2)@W3+b3 (last layer: no relu)."""
    h = jnp.dot(x_ref[...], w1_ref[...], preferred_element_type=jnp.float32)
    h = jnp.maximum(h + b1_ref[...], 0.0)
    h = jnp.dot(h, w2_ref[...], preferred_element_type=jnp.float32)
    h = jnp.maximum(h + b2_ref[...], 0.0)
    h = jnp.dot(h, w3_ref[...], preferred_element_type=jnp.float32)
    o_ref[...] = (h + b3_ref[...]).astype(o_ref.dtype)


def prepare_mlp_params(params, *, lane=128):
    """One-time weight prep (hoisted out of the per-call forward).

    Pads *hidden* widths to a multiple of 128 so the first two matmul N-dims
    and the intermediate activations are lane-dense.  The output layer keeps
    its true width (narrow HBM writeback).  Zero-padding is exact: padded
    columns are 0 pre-ReLU, and the matching padded rows of the next weight
    are 0, so they contribute nothing.
    """
    (w1, b1), (w2, b2), (w3, b3) = params
    f_in = w1.shape[0]
    h1 = _round_up(w1.shape[1], lane)
    h2 = _round_up(w2.shape[1], lane)
    out_dim = w3.shape[1]

    def pad_w(w, rows, cols):
        return jnp.pad(w.astype(jnp.float32),
                       ((0, rows - w.shape[0]), (0, cols - w.shape[1])))

    def pad_b(b, cols):
        return jnp.pad(b.astype(jnp.float32), ((0, 0), (0, cols - b.shape[1])))

    return (pad_w(w1, f_in, h1), pad_b(b1, h1),
            pad_w(w2, h1, h2), pad_b(b2, h2),
            pad_w(w3, h2, out_dim), pad_b(b3, out_dim))


@partial(jax.jit, static_argnames=("tb",))
def mlp_forward(x, prepared_params, *, tb=2048):
    """x: (B, *feature_dims). prepared_params: output of prepare_mlp_params()."""
    w1, b1, w2, b2, w3, b3 = prepared_params
    B = x.shape[0]
    x2d = x.reshape(B, -1)                       # matches torch x.view(B, -1)
    f_in = x2d.shape[1]
    assert w1.shape[0] == f_in, (w1.shape, f_in)
    h1, h2, out_dim = w1.shape[1], w2.shape[1], w3.shape[1]

    # Batch tiling: fat tiles (fewer grid steps), but
    #  * >= 2 steps for large batches so both v7x TensorCores get work,
    #  * no wrapper-side jnp.pad of x -- a ragged last tile is handled by
    #    Pallas's masked boundary DMAs (OOB writes dropped), padding < 8 rows.
    num_tiles = pl.cdiv(B, tb)
    if num_tiles == 1 and B >= 512:
        num_tiles = 2
    if num_tiles == 1:
        tb_eff = B                               # block == full dim: always legal
    else:
        tb_eff = _round_up(pl.cdiv(B, num_tiles), 8)
        num_tiles = pl.cdiv(B, tb_eff)

    def resident(shape):
        # Full-array block, constant block index -> DMA'd once, stays in VMEM.
        return pl.BlockSpec(shape, lambda i: (0, 0))

    # VMEM @ tb=2048: x tile 512 KiB + out tile 32 KiB (x2 buffers each)
    # + resident weights ~0.2 MiB + f32 intermediates ~2 MiB -> far under the
    # 32 MiB default scoped limit on all generations (incl. v7x 64 MiB phys),
    # so no vmem_limit_bytes override is needed at this tile size.
    return pl.pallas_call(
        _mlp_kernel,
        out_shape=jax.ShapeDtypeStruct((B, out_dim), x2d.dtype),
        grid=(num_tiles,),
        in_specs=[
            pl.BlockSpec((tb_eff, f_in), lambda i: (i, 0)),   # x: streamed per tile
            resident((f_in, h1)), resident((1, h1)),
            resident((h1, h2)), resident((1, h2)),
            resident((h2, out_dim)), resident((1, out_dim)),
        ],
        out_specs=pl.BlockSpec((tb_eff, out_dim), lambda i: (i, 0)),
        compiler_params=pltpu.CompilerParams(
            dimension_semantics=("parallel",)),
    )(x2d, w1, b1, w2, b2, w3, b3)


def init_mlp_params(key, dims):
    """Deterministic PyTorch-style init: U(-1/sqrt(fan_in), 1/sqrt(fan_in))."""
    params = []
    for i in range(1, len(dims)):
        fan_in, fan_out = dims[i - 1], dims[i]
        key, kw, kb = jax.random.split(key, 3)
        bound = 1.0 / (fan_in ** 0.5)
        w = jax.random.uniform(kw, (fan_in, fan_out), jnp.float32, -bound, bound)
        b = jax.random.uniform(kb, (1, fan_out), jnp.float32, -bound, bound)
        params.append((w, b))
    return params


def mlp_reference(x, params):
    """Pure-JAX f32 reference for sanity checking."""
    h = x.reshape(x.shape[0], -1)
    for i, (w, b) in enumerate(params):
        h = h @ w + b
        if i < len(params) - 1:
            h = jnp.maximum(h, 0.0)
    return h


if __name__ == "__main__":
    # Module config: MLP(action_no=4, layers=[64, 32, 32])
    #   -> Linear(64, 32) -> ReLU -> Linear(32, 32) -> ReLU -> Linear(32, 4)
    action_no = 4
    layer_dims = [64, 32, 32]
    dims = layer_dims + [action_no]

    key = jax.random.PRNGKey(0)
    key, kx, kx2, kx3 = jax.random.split(key, 4)
    params = init_mlp_params(key, dims)
    prepared = prepare_mlp_params(params)        # one-time weight prep

    # Small check: (batch=2, channels=4, features=16) -> flattened to (2, 64).
    x_small = jax.random.normal(kx, (2, 4, 16), jnp.float32)
    qs = jax.block_until_ready(mlp_forward(x_small, prepared))
    ref = mlp_reference(x_small, params)
    assert qs.shape == (2, action_no), qs.shape
    assert jnp.allclose(qs, ref, atol=2e-2, rtol=2e-2), "mismatch vs reference (small)"

    # Larger batch exercises the multi-tile grid path (grid=(2,), tb_eff=512).
    x_big = jax.random.normal(kx2, (1024, 4, 16), jnp.float32)
    qs_big = jax.block_until_ready(mlp_forward(x_big, prepared))
    ref_big = mlp_reference(x_big, params)
    assert qs_big.shape == (1024, action_no), qs_big.shape
    assert jnp.allclose(qs_big, ref_big, atol=2e-2, rtol=2e-2), "mismatch vs reference (big)"

    # Ragged batch (B=520) exercises masked boundary tiles (no jnp.pad of x).
    x_rag = jax.random.normal(kx3, (520, 4, 16), jnp.float32)
    qs_rag = jax.block_until_ready(mlp_forward(x_rag, prepared))
    ref_rag = mlp_reference(x_rag, params)
    assert qs_rag.shape == (520, action_no), qs_rag.shape
    assert jnp.allclose(qs_rag, ref_rag, atol=2e-2, rtol=2e-2), "mismatch vs reference (ragged)"

    print("KERNEL_OK")
</pallas_src>

<mosaic_0001>
module attributes {stable_mosaic.version = 11 : i64} {
  func.func @_mlp_kernel(%arg0: i32, %arg1: memref<2x64xf32, #tpu.memory_space<vmem>>, %arg2: memref<64x128xf32, #tpu.memory_space<vmem>>, %arg3: memref<1x128xf32, #tpu.memory_space<vmem>>, %arg4: memref<128x128xf32, #tpu.memory_space<vmem>>, %arg5: memref<1x128xf32, #tpu.memory_space<vmem>>, %arg6: memref<128x4xf32, #tpu.memory_space<vmem>>, %arg7: memref<1x4xf32, #tpu.memory_space<vmem>>, %arg8: memref<2x4xf32, #tpu.memory_space<vmem>>) attributes {dimension_semantics = [#tpu.dimension_semantics<parallel>], iteration_bounds = array<i64: 1>, scalar_prefetch = 0 : i64, scratch_operands = 0 : i64, tpu.core_type = #tpu.core_type<tc>, window_params = [{transform_indices = @transform_0, window_bounds = array<i64: 2, 64>}, {pipeline_mode = #tpu.pipeline_mode<synchronous>, transform_indices = @transform_1, window_bounds = array<i64: 64, 128>}, {pipeline_mode = #tpu.pipeline_mode<synchronous>, transform_indices = @transform_2, window_bounds = array<i64: 1, 128>}, {pipeline_mode = #tpu.pipeline_mode<synchronous>, transform_indices = @transform_3, window_bounds = array<i64: 128, 128>}, {pipeline_mode = #tpu.pipeline_mode<synchronous>, transform_indices = @transform_4, window_bounds = array<i64: 1, 128>}, {pipeline_mode = #tpu.pipeline_mode<synchronous>, transform_indices = @transform_5, window_bounds = array<i64: 128, 4>}, {pipeline_mode = #tpu.pipeline_mode<synchronous>, transform_indices = @transform_6, window_bounds = array<i64: 1, 4>}, {transform_indices = @transform_7, window_bounds = array<i64: 2, 4>}]} {
    %c0 = arith.constant 0 : index
    %c0_0 = arith.constant 0 : index
    %0 = vector.load %arg1[%c0, %c0_0] : memref<2x64xf32, #tpu.memory_space<vmem>>, vector<2x64xf32>
    %c0_1 = arith.constant 0 : index
    %c0_2 = arith.constant 0 : index
    %1 = vector.load %arg2[%c0_1, %c0_2] : memref<64x128xf32, #tpu.memory_space<vmem>>, vector<64x128xf32>
    %cst = arith.constant dense<0.000000e+00> : vector<2x128xf32>
    %2 = tpu.matmul %0, %1, %cst {dimension_numbers = #tpu.dot_dimension_numbers<[1], [0], [0], [1], [0, 0, 1, 1], [], []>} : vector<2x64xf32>, vector<64x128xf32>, vector<2x128xf32> -> vector<2x128xf32>
    %c0_3 = arith.constant 0 : index
    %c0_4 = arith.constant 0 : index
    %3 = vector.load %arg3[%c0_3, %c0_4] : memref<1x128xf32, #tpu.memory_space<vmem>>, vector<1x128xf32>
    %4 = vector.broadcast %3 : vector<1x128xf32> to vector<2x128xf32>
    %5 = arith.addf %2, %4 : vector<2x128xf32>
    %cst_5 = arith.constant 0.000000e+00 : f32
    %6 = vector.broadcast %cst_5 : f32 to vector<2x128xf32>
    %7 = arith.maximumf %5, %6 : vector<2x128xf32>
    %c0_6 = arith.constant 0 : index
    %c0_7 = arith.constant 0 : index
    %8 = vector.load %arg4[%c0_6, %c0_7] : memref<128x128xf32, #tpu.memory_space<vmem>>, vector<128x128xf32>
    %cst_8 = arith.constant dense<0.000000e+00> : vector<2x128xf32>
    %9 = tpu.matmul %7, %8, %cst_8 {dimension_numbers = #tpu.dot_dimension_numbers<[1], [0], [0], [1], [0, 0, 1, 1], [], []>} : vector<2x128xf32>, vector<128x128xf32>, vector<2x128xf32> -> vector<2x128xf32>
    %c0_9 = arith.constant 0 : index
    %c0_10 = arith.constant 0 : index
    %10 = vector.load %arg5[%c0_9, %c0_10] : memref<1x128xf32, #tpu.memory_space<vmem>>, vector<1x128xf32>
    %11 = vector.broadcast %10 : vector<1x128xf32> to vector<2x128xf32>
    %12 = arith.addf %9, %11 : vector<2x128xf32>
    %cst_11 = arith.constant 0.000000e+00 : f32
    %13 = vector.broadcast %cst_11 : f32 to vector<2x128xf32>
    %14 = arith.maximumf %12, %13 : vector<2x128xf32>
    %c0_12 = arith.constant 0 : index
    %c0_13 = arith.constant 0 : index
    %15 = vector.load %arg6[%c0_12, %c0_13] : memref<128x4xf32, #tpu.memory_space<vmem>>, vector<128x4xf32>
    %cst_14 = arith.constant dense<0.000000e+00> : vector<2x4xf32>
    %16 = tpu.matmul %14, %15, %cst_14 {dimension_numbers = #tpu.dot_dimension_numbers<[1], [0], [0], [1], [0, 0, 1, 1], [], []>} : vector<2x128xf32>, vector<128x4xf32>, vector<2x4xf32> -> vector<2x4xf32>
    %c0_15 = arith.constant 0 : index
    %c0_16 = arith.constant 0 : index
    %17 = vector.load %arg7[%c0_15, %c0_16] : memref<1x4xf32, #tpu.memory_space<vmem>>, vector<1x4xf32>
    %18 = vector.broadcast %17 : vector<1x4xf32> to vector<2x4xf32>
    %19 = arith.addf %16, %18 : vector<2x4xf32>
    %c0_17 = arith.constant 0 : index
    %c0_18 = arith.constant 0 : index
    %20 = vector.load %arg8[%c0_17, %c0_18] : memref<2x4xf32, #tpu.memory_space<vmem>>, vector<2x4xf32>
    tpu.vector_store %arg8[%c0_17, %c0_18], %19 {strides = array<i32>} : memref<2x4xf32, #tpu.memory_space<vmem>>, vector<2x4xf32>,
    return
  }
  func.func @transform_0(%arg0: i32) -> (i32, i32) {
    %c0_i32 = arith.constant 0 : i32
    %c0_i32_0 = arith.constant 0 : i32
    return %arg0, %c0_i32 : i32, i32
  }
  func.func @transform_1(%arg0: i32) -> (i32, i32) {
    %c0_i32 = arith.constant 0 : i32
    %c0_i32_0 = arith.constant 0 : i32
    %c0_i32_1 = arith.constant 0 : i32
    return %c0_i32, %c0_i32_0 : i32, i32
  }
  func.func @transform_2(%arg0: i32) -> (i32, i32) {
    %c0_i32 = arith.constant 0 : i32
    %c0_i32_0 = arith.constant 0 : i32
    %c0_i32_1 = arith.constant 0 : i32
    return %c0_i32, %c0_i32_0 : i32, i32
  }
  func.func @transform_3(%arg0: i32) -> (i32, i32) {
    %c0_i32 = arith.constant 0 : i32
    %c0_i32_0 = arith.constant 0 : i32
    %c0_i32_1 = arith.constant 0 : i32
    return %c0_i32, %c0_i32_0 : i32, i32
  }
  func.func @transform_4(%arg0: i32) -> (i32, i32) {
    %c0_i32 = arith.constant 0 : i32
    %c0_i32_0 = arith.constant 0 : i32
    %c0_i32_1 = arith.constant 0 : i32
    return %c0_i32, %c0_i32_0 : i32, i32
  }
  func.func @transform_5(%arg0: i32) -> (i32, i32) {
    %c0_i32 = arith.constant 0 : i32
    %c0_i32_0 = arith.constant 0 : i32
    %c0_i32_1 = arith.constant 0 : i32
    return %c0_i32, %c0_i32_0 : i32, i32
  }
  func.func @transform_6(%arg0: i32) -> (i32, i32) {
    %c0_i32 = arith.constant 0 : i32
    %c0_i32_0 = arith.constant 0 : i32
    %c0_i32_1 = arith.constant 0 : i32
    return %c0_i32, %c0_i32_0 : i32, i32
  }
  func.func @transform_7(%arg0: i32) -> (i32, i32) {
    %c0_i32 = arith.constant 0 : i32
    %c0_i32_0 = arith.constant 0 : i32
    return %arg0, %c0_i32 : i32, i32
  }
}

</mosaic_0001>

<bundles_post_ra>
// kernel: mlp_forward.1
= control target key start
LH: loop header
LB: loop body
LE: loop exit
PB: predicated region body
PF: predicated region fallthrough
CT: control target
= control target key end

     0   :  { %12 = vsyncpa [#allocation3], 0  ;;  %s789_s0 = inlined_call_operand.vmem [shape: f32[2,64], index: 0, kind: input, shape index: {}]   ;;  %s790_s1 = inlined_call_operand.hbm [shape: f32[64,128], index: 1, kind: input, shape index: {}]   ;;  %s791_s2 = inlined_call_operand.vmem [shape: f32[1,128], index: 2, kind: input, shape index: {}]   ;;  %s792_s3 = inlined_call_operand.vmem [shape: f32[128,128], index: 3, kind: input, shape index: {}]   ;;  %s793_s4 = inlined_call_operand.vmem [shape: f32[1,128], index: 4, kind: input, shape index: {}]   ;;  %s794_s5 = inlined_call_operand.vmem [shape: f32[128,4], index: 5, kind: input, shape index: {}]   ;;  %s795_s6 = inlined_call_operand.vmem [shape: f32[1,4], index: 6, kind: input, shape index: {}]   ;;  %s796_s7 = inlined_call_operand.hbm [shape: f32[2,4], index: 7, kind: output, shape index: {}]  }
   0x1   :  { %13 = vsyncpa [#allocation4], 0  ;;  %s587_s24 = smov [#allocation2]   ;;  %s539_s28 = scalar_lea.hbm %s790_s1, 1024 }
   0x2   :  { %s21_s25 = sshll.u32 %s587_s24, 4  ;;  %p540_p0 = scmp.ne.s32.totalorder %s790_s1, %s539_s28  ;;  %s22_s25 = int_to_ptr.vmem [resolvable:$true] %s21_s25 }
   0x3   :  { %p543_p1 = scmp.lt.u32.totalorder %s539_s28, %s790_s1 }
   0x5   :  { %p545_p2 = pnand %p543_p1, %p540_p0 }
   0x7   :  { %548 = shalt.err (!%p545_p2)
}
   0x8   :  { %s549_s10 = scalar_lea.vmem %s22_s25, 1024  ;;  %p554_p4 = scmp.lt.s32.totalorder %s22_s25, %s22_s25 }
   0x9   :  { %p550_p3 = scmp.ne.s32.totalorder %s22_s25, %s549_s10  ;;  %p555_p5 = scmp.lt.s32.totalorder %s549_s10, %s549_s10 }
   0xb   :  { %p556_p6 = por %p555_p5, %p554_p4 }
   0xd   :  { %p557_p7 = pnand %p556_p6, %p550_p3 }
   0xf   :  { %560 = shalt.err (!%p557_p7)
}
  0x10   :  { %s588_s11 = smov 128   ;;  %s589_s12 = smov 8  }
  0x11   :  { %27 = dma.hbm_to_vmem [thread:$0]  %s790_s1, 1024, %s22_s25, [#allocation3], %s588_s11, %s588_s11, %s589_s12  }
  0x12   :  { %583 = dma.done.wait [#allocation3], 1024  }
  0x13   :  { %584 = vsyncadd [#allocation3], 4294966272  ;;  %v590_v0 = vmov 0.0|0.0   ;;  %vm591_vm0 = vmmov 0   ;;  %v592_v1 = vmov 0.0   ;;  %v42_v2 = vld [vmem:[#allocation2] sm:$0xff] }
  0x14   :  { %472 = vmatprep.subr.bf16.mxu0 %v590_v0  ;;  %399 = vmatprep.mubr.msk.f32.mxu0 %vm591_vm0, %v592_v1  ;;  %v43_v3 = vld [vmem:[#allocation2 + $0x8] sm:$0xff]  ;;  %v44_v4 = vld [vmem:[#allocation2 + $0x10] sm:$0xff]  ;;  %v45_v6 = vld [vmem:[#allocation2 + $0x18] sm:$0xff]  ;;  %vm57_vm1 = vcmask 523264   ;;  %s593_s10 = smov [#allocation5]   ;;  %vm319_vm2 = vcmask 25600  }
  0x15   :  { %484 = vmatprep.subr.bf16.mxu1 %v590_v0  ;;  %434 = vmatprep.mubr.msk.f32.mxu1 %vm591_vm0, %v592_v1  ;;  %v473_v5 = vpack.c.bf16 %v43_v3, %v42_v2  ;;  %v476_v7 = vpack.c.bf16 %v45_v6, %v44_v4  ;;  %v132_v8 = vld [vmem:[%s792_s3] sm:$0xff]  ;;  %v133_v9 = vld [vmem:[%s792_s3 + $0x8] sm:$0xff]  ;;  %v134_v10 = vld [vmem:[%s792_s3 + $0x10] sm:$0xff]  ;;  %s327_s11 = sshll.u32 %s593_s10, 4  ;;  %s328_s11 = int_to_ptr.vmem [resolvable:$true] %s327_s11 }
  0x16   :  { %v46_v11 = vld [vmem:[#allocation2 + $0x20] sm:$0xff]  ;;  %v47_v12 = vld [vmem:[#allocation2 + $0x28] sm:$0xff]  ;;  %v485_v13 = vpack.c.bf16 %v133_v9, %v132_v8  ;;  %v135_v14 = vld [vmem:[%s792_s3 + $0x18] sm:$0xff]  ;;  %p566_p9 = scmp.lt.s32.totalorder %s328_s11, %s328_s11 }
  0x17   :  { %474 = vmatpush3.bf16.msra.mxu0 %v473_v5  ;;  %v488_v15 = vpack.c.bf16 %v135_v14, %v134_v10  ;;  %v479_v16 = vpack.c.bf16 %v47_v12, %v46_v11  ;;  %v136_v17 = vld [vmem:[%s792_s3 + $0x20] sm:$0xff]  ;;  %v137_v18 = vld [vmem:[%s792_s3 + $0x28] sm:$0xff]  ;;  %v48_v19 = vld [vmem:[#allocation2 + $0x30] sm:$0xff] }
  0x18   :  { %475 = vmatprep.subr.bf16.mxu0 %v590_v0  ;;  %486 = vmatpush3.bf16.msra.mxu1 %v485_v13  ;;  %v49_v20 = vld [vmem:[#allocation2 + $0x38] sm:$0xff]  ;;  %v491_v21 = vpack.c.bf16 %v137_v18, %v136_v17  ;;  %v138_v23 = vld [vmem:[%s792_s3 + $0x30] sm:$0xff]  ;;  %v139_v24 = vld [vmem:[%s792_s3 + $0x38] sm:$0xff] }
  0x19   :  { %487 = vmatprep.subr.bf16.mxu1 %v590_v0  ;;  %v482_v22 = vpack.c.bf16 %v49_v20, %v48_v19  ;;  %v494_v25 = vpack.c.bf16 %v139_v24, %v138_v23  ;;  %v41_v26 = vld [vmem:[%s789_s0] sm:$0x3]  ;;  %v141_v28 = vld [vmem:[%s792_s3 + $0x48] sm:$0xff]  ;;  %v142_v30 = vld [vmem:[%s792_s3 + $0x50] sm:$0xff] }
  0x1a   :  { %v140_v27 = vld [vmem:[%s792_s3 + $0x40] sm:$0xff]  ;;  %v143_v31 = vld [vmem:[%s792_s3 + $0x58] sm:$0xff]  ;;  %v145_v34 = vld [vmem:[%s792_s3 + $0x68] sm:$0xff] }
  0x1b   :  { %477 = vmatpush3.bf16.msra.mxu0 %v476_v7  ;;  %v497_v29 = vpack.c.bf16 %v141_v28, %v140_v27  ;;  %v500_v32 = vpack.c.bf16 %v143_v31, %v142_v30  ;;  %v144_v33 = vld [vmem:[%s792_s3 + $0x60] sm:$0xff]  ;;  %v146_v36 = vld [vmem:[%s792_s3 + $0x70] sm:$0xff]  ;;  %v147_v37 = vld [vmem:[%s792_s3 + $0x78] sm:$0xff] }
  0x1c   :  { %478 = vmatprep.subr.bf16.mxu0 %v590_v0  ;;  %489 = vmatpush3.bf16.msra.mxu1 %v488_v15  ;;  %v503_v35 = vpack.c.bf16 %v145_v34, %v144_v33  ;;  %v506_v38 = vpack.c.bf16 %v147_v37, %v146_v36  ;;  %v226_v39 = vld [vmem:[%s794_s5] sm:$0xff]  ;;  %v227_v40 = vld [vmem:[%s794_s5 + $0x8] sm:$0xff]  ;;  %v228_v41 = vld [vmem:[%s794_s5 + $0x10] sm:$0xff] }
  0x1d   :  { %490 = vmatprep.subr.bf16.mxu1 %v590_v0  ;;  %v509_v42 = vpack.c.bf16 %v227_v40, %v226_v39  ;;  %v229_v43 = vld [vmem:[%s794_s5 + $0x18] sm:$0xff]  ;;  %v230_v45 = vld [vmem:[%s794_s5 + $0x20] sm:$0xff]  ;;  %v231_v46 = vld [vmem:[%s794_s5 + $0x28] sm:$0xff] }
  0x1e   :  { %v512_v44 = vpack.c.bf16 %v229_v43, %v228_v41  ;;  %v515_v47 = vpack.c.bf16 %v231_v46, %v230_v45  ;;  %v232_v48 = vld [vmem:[%s794_s5 + $0x30] sm:$0xff]  ;;  %v233_v49 = vld [vmem:[%s794_s5 + $0x38] sm:$0xff]  ;;  %v234_v51 = vld [vmem:[%s794_s5 + $0x40] sm:$0xff] }
  0x1f   :  { %480 = vmatpush3.bf16.msra.mxu0 %v479_v16  ;;  %v518_v50 = vpack.c.bf16 %v233_v49, %v232_v48  ;;  %v235_v52 = vld [vmem:[%s794_s5 + $0x48] sm:$0xff]  ;;  %v236_v54 = vld [vmem:[%s794_s5 + $0x50] sm:$0xff]  ;;  %v237_v55 = vld [vmem:[%s794_s5 + $0x58] sm:$0xff] }
  0x20   :  { %481 = vmatprep.subr.bf16.mxu0 %v590_v0  ;;  %492 = vmatpush3.bf16.msra.mxu1 %v491_v21  ;;  %v521_v53 = vpack.c.bf16 %v235_v52, %v234_v51  ;;  %v524_v56 = vpack.c.bf16 %v237_v55, %v236_v54  ;;  %v238_v57 = vld [vmem:[%s794_s5 + $0x60] sm:$0xff]  ;;  %v239_v58 = vld [vmem:[%s794_s5 + $0x68] sm:$0xff]  ;;  %v240_v2 = vld [vmem:[%s794_s5 + $0x70] sm:$0xff] }
  0x21   :  { %493 = vmatprep.subr.bf16.mxu1 %v590_v0  ;;  %v527_v59 = vpack.c.bf16 %v239_v58, %v238_v57  ;;  %v336_v60 = vld [vmem:[%s791_s2] ss:$0 sm:$0xff]  ;;  %v241_v3 = vld [vmem:[%s794_s5 + $0x78] sm:$0xff]  ;;  %s561_s5 = scalar_lea.vmem %s328_s11, 32 }
  0x22   :  { %v530_v4 = vpack.c.bf16 %v241_v3, %v240_v2  ;;  %v339_v9 = vld [vmem:[%s795_s6] ss:$0 sm:$0xff]  ;;  %p562_p8 = scmp.ne.s32.totalorder %s328_s11, %s561_s5  ;;  %p567_p10 = scmp.lt.s32.totalorder %s561_s5, %s561_s5 }
  0x23   :  { %483 = vmatpush3.bf16.msra.mxu0 %v482_v22 }
  0x24   :  { %508 = vmatprep.subr.bf16.mxu0 %v590_v0  ;;  %495 = vmatpush3.bf16.msra.mxu1 %v494_v25  ;;  %p568_p11 = por %p567_p10, %p566_p9 }
  0x25   :  { %496 = vmatprep.subr.bf16.mxu1 %v590_v0 }
  0x26   :  { %400 = vmatmul.mubr.msk.f32.vlgmr.msra.gmra.mrb[0].mxu0 %vm57_vm1, %v41_v26  ;;  %p569_p12 = pnand %p568_p11, %p562_p8 }
  0x27   :  { %469 = vmatprep.mubr.msk.f32.mxu0 %vm591_vm0, %v592_v1  ;;  %510 = vmatpush3.bf16.msra.mxu0 %v509_v42 }
  0x28   :  { %498 = vmatpush3.bf16.msra.mxu1 %v497_v29  ;;  %511 = vmatprep.subr.bf16.mxu0 %v590_v0 }
  0x29   :  { %499 = vmatprep.subr.bf16.mxu1 %v590_v0 }
  0x2b   :  { %513 = vmatpush3.bf16.msra.mxu0 %v512_v44 }
  0x2c   :  { %501 = vmatpush3.bf16.msra.mxu1 %v500_v32  ;;  %514 = vmatprep.subr.bf16.mxu0 %v590_v0 }
  0x2d   :  { %502 = vmatprep.subr.bf16.mxu1 %v590_v0 }
  0x2f   :  { %516 = vmatpush3.bf16.msra.mxu0 %v515_v47 }
  0x30   :  { %504 = vmatpush3.bf16.msra.mxu1 %v503_v35  ;;  %517 = vmatprep.subr.bf16.mxu0 %v590_v0 }
  0x31   :  { %505 = vmatprep.subr.bf16.mxu1 %v590_v0 }
  0x33   :  { %519 = vmatpush3.bf16.msra.mxu0 %v518_v50 }
  0x34   :  { %507 = vmatpush3.bf16.msra.mxu1 %v506_v38  ;;  %520 = vmatprep.subr.bf16.mxu0 %v590_v0 }
  0x37   :  { %522 = vmatpush3.bf16.msra.mxu0 %v521_v53 }
  0x38   :  { %523 = vmatprep.subr.bf16.mxu0 %v590_v0 }
  0x3b   :  { %525 = vmatpush3.bf16.msra.mxu0 %v524_v56 }
  0x3c   :  { %526 = vmatprep.subr.bf16.mxu0 %v590_v0 }
  0x3f   :  { %528 = vmatpush3.bf16.msra.mxu0 %v527_v59 }
  0x40   :  { %529 = vmatprep.subr.bf16.mxu0 %v590_v0  ;;  %v338_v0 = vld [vmem:[%s793_s4] ss:$0 sm:$0xff] }
  0x43   :  { %531 = vmatpush3.bf16.msra.mxu0 %v530_v4 }
  0xf9   :  { %v127_v61 = vpop.f32.mrb[0].mxu0 }
  0xfa   :  { %v128_v62 = vadd.f32 %v336_v60, %v127_v61  ;;  %v401_v63 = vpop.f32.mrb[1].mxu0 }
  0xfc   :  { %v131_v1 = vmax.f32 %v128_v62, 0.0 }
  0xfe   :  { %435 = vmatmul.mubr.f32.vlgmr.msra.gmra.mrb[0].mxu1 %v131_v1 }
 0x1d1   :  { %v221_v5 = vpop.f32.mrb[0].mxu1 }
 0x1d2   :  { %v222_v6 = vadd.f32 %v338_v0, %v221_v5  ;;  %v436_v7 = vpop.f32.mrb[1].mxu1 }
 0x1d4   :  { %v225_v8 = vmax.f32 %v222_v6, 0.0 }
 0x1d6   :  { %470 = vmatmul.mubr.f32.vlgmr.msra.gmra.mrb[2].mxu0 %v225_v8 }
 0x2a9   :  { %v315_v10 = vpop.f32.mrb[2].mxu0 }
 0x2aa   :  { %v316_v11 = vadd.f32 %v339_v9, %v315_v10  ;;  %v471_v12 = vpop.f32.mrb[3].mxu0 }
 0x2ac   :  { %320 = vst.msk [vmem:[#allocation5] sm:$0x3] %vm319_vm2, %v316_v11 }
 0x2ad   :  { %572 = shalt.err (!%p569_p12)
}
 0x2ae   :  { %s573_s13 = scalar_lea.hbm %s796_s7, 32 }
 0x2af   :  { %p574_p13 = scmp.ne.s32.totalorder %s796_s7, %s573_s13  ;;  %p577_p0 = scmp.lt.u32.totalorder %s573_s13, %s796_s7 }
 0x2b1   :  { %p579_p1 = pnand %p577_p0, %p574_p13 }
 0x2b3   :  { %582 = shalt.err (!%p579_p1)
}
 0x2b4   :  { %330 = dma.vmem_to_hbm [thread:$0]  %s328_s11, 32, %s796_s7, [#allocation4]  }
 0x2b5   :  { %585 = dma.done.wait [#allocation4], 32  }
 0x2b6   :  { %586 = vsyncadd [#allocation4], 4294967264 }
 0x2b7   :  { %334 = vsyncpa [#allocation3], 1 }
 0x2b8   :  { %335 = vsyncpa [#allocation4], 1 }

</bundles_post_ra>
